<compile_context>
chip_gen: v7x
topology: tpu7x:2x2x1
jax: 0.10.0
libtpu: 0.0.40
codegen_flags: <defaults>
</compile_context>

<pallas_src>
import functools

import jax
import jax.numpy as jnp
from jax import lax
from jax.experimental import pallas as pl
from jax.experimental.pallas import tpu as pltpu


_LANE = 128            # lane width / v5e MXU dimension
_MXU_MULT = 256        # v6e/v7x MXU dimension (also a multiple of 128)
_MAX_TK = 1 << 18      # sanity cap only; never binding for real VGG shapes


@functools.lru_cache(maxsize=None)
def _tpu_vmem_capacity_bytes():
    """Per-TensorCore VMEM capacity; conservative 64 MiB (v7x) if unknown."""
    try:
        return int(pltpu.get_tpu_info().vmem_capacity_bytes)
    except Exception:
        return 64 << 20


@functools.lru_cache(maxsize=None)
def _device_kind():
    try:
        return jax.devices()[0].device_kind.lower()
    except Exception:
        return ""


def _num_tensorcores_per_device():
    # v4 / v5p megacore and v7x expose 2 TensorCores per device.
    kind = _device_kind()
    return 2 if any(tag in kind for tag in ("v7", "7x", "v4", "v5p")) else 1


def _is_v5e():
    kind = _device_kind()
    return ("v5e" in kind) or ("v5 lite" in kind) or ("v5litepod" in kind)


def _k_tile_budget_bytes():
    # Total bytes allowed for the pipelined F buffers (all operands, all bufs).
    return (44 << 20) if _tpu_vmem_capacity_bytes() >= (96 << 20) else (22 << 20)


def _vmem_ceiling_bytes():
    # Scoped-VMEM request ceiling; leave headroom for compiler internal
    # scratch / output staging (v7x has only 64 MiB physical per TensorCore).
    return (96 << 20) if _tpu_vmem_capacity_bytes() >= (96 << 20) else (46 << 20)


def _plan(x, use_bf16, allow_split):
    """Tiling / buffering / VMEM plan + the prepared (ab, cd_pad) feature matrix."""
    a, b, c, d = x.shape
    ab, cd = a * b, c * d
    dtype = jnp.bfloat16 if use_bf16 else x.dtype
    itemsize = jnp.dtype(dtype).itemsize

    # Late VGG layers have tiny spatial dims (7x7=49, 14x14=196): pad K only to
    # the 128-lane multiple there instead of the full 256 MXU tile.
    mult = _LANE if cd < _MXU_MULT else _MXU_MULT
    cd_aligned = pl.cdiv(cd, mult) * mult

    # 2-way TensorCore split of the Gram rows (M) on 2-TC chips (v7x/megacore),
    # only for large ab where the kernel is MXU-bound; small ab is HBM-bound
    # and must not duplicate the K-stream reads.
    split = bool(allow_split and _num_tensorcores_per_device() >= 2
                 and ab >= 256 and ab % 16 == 0)

    # Deeper F pipeline on v5e (lowest HBM BW) for memory-bound small ab.
    f_buffers = 3 if (_is_v5e() and ab < 128 and not split) else 2

    if split:
        # Per core: rows operand (ab/2, tk) + cols operand (ab, tk), 2 bufs each.
        bytes_per_k = 2 * (max(ab // 2, 8) + max(ab, 8)) * itemsize
    else:
        bytes_per_k = f_buffers * max(ab, 8) * itemsize

    cap = max(mult, min((_k_tile_budget_bytes() // bytes_per_k) // mult * mult,
                        _MAX_TK))
    tk = min(cd_aligned, cap)
    # Keep each per-row DMA chunk >= ~1 KiB (each K-tile DMA is `ab` strided
    # rows of tk*itemsize contiguous bytes; matters for bf16/int8, small ab).
    row_floor = pl.cdiv(pl.cdiv(1024, itemsize), mult) * mult
    tk = max(tk, min(row_floor, cd_aligned))

    n_k = pl.cdiv(cd, tk)
    if n_k <= 2:
        f_buffers = 2            # deep pipeline pointless for <= 2 K steps
    cd_pad = n_k * tk

    f = x.reshape(ab, cd)
    if use_bf16:
        f = f.astype(jnp.bfloat16)
    if cd_pad != cd:
        # Zero K-padding contributes nothing to F F^T -> exact.
        f = jnp.pad(f, ((0, 0), (0, cd_pad - cd)))

    acc_rows = ab // 2 if split else ab
    need = (bytes_per_k * tk           # pipelined F buffers
            + 2 * acc_rows * ab * 4    # resident target-G block (2 bufs worst case)
            + acc_rows * ab * 4        # f32 accumulator scratch
            + ab * ab * 4              # full-G output (gram_matrix case)
            + (2 << 20))               # slack
    vmem_limit = int(min(max(need, 16 << 20), _vmem_ceiling_bytes()))

    return dict(ab=ab, cd_pad=cd_pad, tk=tk, n_k=n_k, f=f, split=split,
                f_buffers=f_buffers, itemsize=itemsize,
                inv_norm=1.0 / float(a * b * c * d), vmem_limit=vmem_limit)


def _f_block_spec(rows, tk, index_map, n_buffers):
    if n_buffers == 2:
        return pl.BlockSpec((rows, tk), index_map)
    # Deeper pipeline on the streamed F operand (v5e, memory-bound small ab).
    return pl.BlockSpec((rows, tk), index_map, pipeline_mode=pl.Buffered(n_buffers))


def _partial_gram(lhs, rhs):
    """MXU: lhs @ rhs^T expressed as dot_general (no transpose copy), f32 acc."""
    return lax.dot_general(lhs, rhs,
                           dimension_numbers=(((1,), (1,)), ((), ())),
                           preferred_element_type=jnp.float32)


# ---------------------------------------------------------------------------
# gram matrix kernel (used once, at construction time, for the target)
# ---------------------------------------------------------------------------
def _gram_kernel(f_ref, g_ref, acc_ref, *, inv_norm):
    k = pl.program_id(0)

    @pl.when(k == 0)
    def _():
        acc_ref[...] = jnp.zeros_like(acc_ref)

    acc_ref[...] += _partial_gram(f_ref[...], f_ref[...])

    @pl.when(k == pl.num_programs(0) - 1)
    def _():
        g_ref[...] = acc_ref[...] * inv_norm


def gram_matrix(x, use_bf16=False):
    """Pallas gram matrix of an NCHW tensor: (F F^T) / (a*b*c*d), f32 output."""
    plan = _plan(x, use_bf16, allow_split=False)
    ab, tk, cd_pad = plan["ab"], plan["tk"], plan["cd_pad"]
    return pl.pallas_call(
        functools.partial(_gram_kernel, inv_norm=plan["inv_norm"]),
        out_shape=jax.ShapeDtypeStruct((ab, ab), jnp.float32),
        grid_spec=pltpu.PrefetchScalarGridSpec(
            num_scalar_prefetch=0,
            grid=(plan["n_k"],),
            in_specs=[_f_block_spec(ab, tk, lambda k: (0, k), plan["f_buffers"])],
            out_specs=pl.BlockSpec((ab, ab), lambda k: (0, 0)),
            scratch_shapes=[pltpu.VMEM((ab, ab), jnp.float32)],
        ),
        compiler_params=pltpu.CompilerParams(
            dimension_semantics=("arbitrary",),
            vmem_limit_bytes=plan["vmem_limit"],
        ),
        cost_estimate=pl.CostEstimate(
            flops=2 * ab * ab * cd_pad,
            transcendentals=0,
            bytes_accessed=ab * cd_pad * plan["itemsize"] + ab * ab * 4,
        ),
    )(plan["f"])


# ---------------------------------------------------------------------------
# fused gram + MSE-vs-target kernels (the per-step forward hot path)
# ---------------------------------------------------------------------------
def _style_loss_kernel(f_ref, tgt_ref, loss_ref, acc_ref, *, inv_norm, inv_count):
    k = pl.program_id(0)

    @pl.when(k == 0)
    def _():
        acc_ref[...] = jnp.zeros_like(acc_ref)

    acc_ref[...] += _partial_gram(f_ref[...], f_ref[...])

    @pl.when(k == pl.num_programs(0) - 1)
    def _():
        diff = acc_ref[...] * inv_norm - tgt_ref[...]
        loss_ref[0, 0] = jnp.sum(diff * diff) * inv_count


def _style_loss_kernel_split(f_rows_ref, f_cols_ref, tgt_ref, loss_ref, acc_ref,
                             *, inv_norm, inv_count):
    # Leading grid axis splits the Gram rows across TensorCores; each block
    # emits a partial sum of squared diffs which the wrapper adds.
    k = pl.program_id(1)

    @pl.when(k == 0)
    def _():
        acc_ref[...] = jnp.zeros_like(acc_ref)

    acc_ref[...] += _partial_gram(f_rows_ref[...], f_cols_ref[...])

    @pl.when(k == pl.num_programs(1) - 1)
    def _():
        diff = acc_ref[...] * inv_norm - tgt_ref[...]
        loss_ref[0, 0] = jnp.sum(diff * diff) * inv_count


def style_loss_value(x, target_G, use_bf16=False):
    plan = _plan(x, use_bf16, allow_split=True)
    ab, tk, cd_pad = plan["ab"], plan["tk"], plan["cd_pad"]
    inv_count = 1.0 / float(ab * ab)            # F.mse_loss default: mean
    tgt = target_G.astype(jnp.float32)

    if plan["split"]:
        half = ab // 2
        loss = pl.pallas_call(
            functools.partial(_style_loss_kernel_split,
                              inv_norm=plan["inv_norm"], inv_count=inv_count),
            out_shape=jax.ShapeDtypeStruct((2, 1), jnp.float32),
            grid_spec=pltpu.PrefetchScalarGridSpec(
                num_scalar_prefetch=0,
                grid=(2, plan["n_k"]),
                in_specs=[
                    pl.BlockSpec((half, tk), lambda m, k: (m, k)),   # F rows (per core)
                    pl.BlockSpec((ab, tk), lambda m, k: (0, k)),     # F cols (full)
                    pl.BlockSpec((half, ab), lambda m, k: (m, 0)),   # target G rows
                ],
                out_specs=pl.BlockSpec((1, 1), lambda m, k: (m, 0),
                                       memory_space=pltpu.MemorySpace.SMEM),
                scratch_shapes=[pltpu.VMEM((half, ab), jnp.float32)],
            ),
            compiler_params=pltpu.CompilerParams(
                dimension_semantics=("parallel", "arbitrary"),
                vmem_limit_bytes=plan["vmem_limit"],
            ),
            cost_estimate=pl.CostEstimate(
                flops=2 * ab * ab * cd_pad + 3 * ab * ab,
                transcendentals=0,
                bytes_accessed=3 * ab * cd_pad * plan["itemsize"] + ab * ab * 4 + 8,
            ),
        )(plan["f"], plan["f"], tgt)
        return jnp.sum(loss)

    # Single-TensorCore path (small / memory-bound ab).
    # TODO(synk): the resident target-G block is only fetched once (constant
    # index map) but still reserves 2 pipeline buffers; pl.Buffered(1) would
    # trim ab^2*4 B of VMEM and is left default for portability.
    loss = pl.pallas_call(
        functools.partial(_style_loss_kernel,
                          inv_norm=plan["inv_norm"], inv_count=inv_count),
        out_shape=jax.ShapeDtypeStruct((1, 1), jnp.float32),
        grid_spec=pltpu.PrefetchScalarGridSpec(
            num_scalar_prefetch=0,
            grid=(plan["n_k"],),
            in_specs=[
                _f_block_spec(ab, tk, lambda k: (0, k), plan["f_buffers"]),
                pl.BlockSpec((ab, ab), lambda k: (0, 0)),    # target G: resident
            ],
            out_specs=pl.BlockSpec((1, 1), lambda k: (0, 0),
                                   memory_space=pltpu.MemorySpace.SMEM),
            scratch_shapes=[pltpu.VMEM((ab, ab), jnp.float32)],
        ),
        compiler_params=pltpu.CompilerParams(
            dimension_semantics=("arbitrary",),
            vmem_limit_bytes=plan["vmem_limit"],
        ),
        cost_estimate=pl.CostEstimate(
            flops=2 * ab * ab * cd_pad + 3 * ab * ab,
            transcendentals=0,
            bytes_accessed=ab * cd_pad * plan["itemsize"] + ab * ab * 4 + 4,
        ),
    )(plan["f"], tgt)
    return loss[0, 0]


class StyleLoss:
    """JAX/Pallas equivalent of the PyTorch StyleLoss module."""

    def __init__(self, target_feature, use_bf16=False):
        # Target gram matrix is fixed ("detached") at construction time.
        # use_bf16=True feeds the MXU bf16 (halved HBM bytes, ~3x matmul rate)
        # at ~1e-3 relative Gram error; off by default for exact f32.
        self.use_bf16 = use_bf16
        self.target = jax.block_until_ready(
            gram_matrix(target_feature, use_bf16=use_bf16))
        self.loss = None

    def __call__(self, x):
        self.loss = style_loss_value(x, self.target, use_bf16=self.use_bf16)
        return x  # module is a passthrough; it only records the loss


def _reference(x, target_feature):
    """Pure-JAX reference for correctness checking."""
    def gram(t):
        a, b, c, d = t.shape
        f = t.reshape(a * b, c * d).astype(jnp.float32)
        return (f @ f.T) / float(a * b * c * d)

    G = gram(x)
    T = gram(target_feature)
    return jnp.mean((G - T) ** 2)


if __name__ == "__main__":
    key = jax.random.PRNGKey(0)
    k1, k2 = jax.random.split(key)

    # Small NCHW shapes: batch=2, channels=4, H=W=16.
    target_feature = jax.random.normal(k1, (2, 4, 16, 16), dtype=jnp.float32)
    x = jax.random.normal(k2, (2, 4, 16, 16), dtype=jnp.float32)

    module = StyleLoss(target_feature)
    out = module(x)
    loss = jax.block_until_ready(module.loss)
    out = jax.block_until_ready(out)

    # Sanity checks against a pure-JAX reference (exact f32 path).
    ref_loss = _reference(x, target_feature)
    assert out.shape == x.shape and jnp.allclose(out, x), "forward must be identity"
    assert jnp.allclose(loss, ref_loss, rtol=1e-5, atol=1e-6), (loss, ref_loss)

    # Opt-in bf16 MXU-feed path: smoke test with a loose tolerance (bf16
    # features lose ~3 decimal digits in the Gram matrices).
    module_bf16 = StyleLoss(target_feature, use_bf16=True)
    module_bf16(x)
    loss_bf16 = jax.block_until_ready(module_bf16.loss)
    assert bool(jnp.isfinite(loss_bf16)), loss_bf16
    assert abs(float(loss_bf16) - float(ref_loss)) <= 0.25 * max(float(ref_loss), 1e-6), (
        loss_bf16, ref_loss)

    print("KERNEL_OK")
</pallas_src>

<mosaic_0001>
module attributes {stable_mosaic.version = 11 : i64} {
  func.func @_gram_kernel(%arg0: i32, %arg1: memref<8x256xf32, #tpu.memory_space<vmem>>, %arg2: memref<8x8xf32, #tpu.memory_space<vmem>>, %arg3: memref<8x8xf32, #tpu.memory_space<vmem>>) attributes {dimension_semantics = [#tpu.dimension_semantics<arbitrary>], iteration_bounds = array<i64: 1>, scalar_prefetch = 0 : i64, scratch_operands = 1 : i64, tpu.core_type = #tpu.core_type<tc>, window_params = [{transform_indices = @transform_0, window_bounds = array<i64: 8, 256>}, {pipeline_mode = #tpu.pipeline_mode<synchronous>, transform_indices = @transform_1, window_bounds = array<i64: 8, 8>}]} {
    %c0_i32 = arith.constant 0 : i32
    %0 = arith.cmpi eq, %arg0, %c0_i32 : i32
    %1 = arith.extui %0 : i1 to i32
    %c0_i32_0 = arith.constant 0 : i32
    %2 = arith.cmpi ne, %1, %c0_i32_0 : i32
    scf.if %2 {
      %cst_10 = arith.constant 0.000000e+00 : f32
      %12 = vector.broadcast %cst_10 : f32 to vector<8x8xf32>
      %c0_11 = arith.constant 0 : index
      %c0_12 = arith.constant 0 : index
      %13 = vector.load %arg3[%c0_11, %c0_12] : memref<8x8xf32, #tpu.memory_space<vmem>>, vector<8x8xf32>
      tpu.vector_store %arg3[%c0_11, %c0_12], %12 {strides = array<i32>} : memref<8x8xf32, #tpu.memory_space<vmem>>, vector<8x8xf32>,
    } else {
    }
    %c0 = arith.constant 0 : index
    %c0_1 = arith.constant 0 : index
    %3 = vector.load %arg3[%c0, %c0_1] : memref<8x8xf32, #tpu.memory_space<vmem>>, vector<8x8xf32>
    %c0_2 = arith.constant 0 : index
    %c0_3 = arith.constant 0 : index
    %4 = vector.load %arg1[%c0_2, %c0_3] : memref<8x256xf32, #tpu.memory_space<vmem>>, vector<8x256xf32>
    %c0_4 = arith.constant 0 : index
    %c0_5 = arith.constant 0 : index
    %5 = vector.load %arg1[%c0_4, %c0_5] : memref<8x256xf32, #tpu.memory_space<vmem>>, vector<8x256xf32>
    %cst = arith.constant dense<0.000000e+00> : vector<8x8xf32>
    %6 = tpu.matmul %4, %5, %cst {dimension_numbers = #tpu.dot_dimension_numbers<[1], [1], [0], [0], [0, 0, 1, 0], [], []>} : vector<8x256xf32>, vector<8x256xf32>, vector<8x8xf32> -> vector<8x8xf32>
    %7 = arith.addf %3, %6 : vector<8x8xf32>
    %c0_6 = arith.constant 0 : index
    %c0_7 = arith.constant 0 : index
    %8 = vector.load %arg3[%c0_6, %c0_7] : memref<8x8xf32, #tpu.memory_space<vmem>>, vector<8x8xf32>
    tpu.vector_store %arg3[%c0_6, %c0_7], %7 {strides = array<i32>} : memref<8x8xf32, #tpu.memory_space<vmem>>, vector<8x8xf32>,
    %c0_i32_8 = arith.constant 0 : i32
    %9 = arith.cmpi eq, %arg0, %c0_i32_8 : i32
    %10 = arith.extui %9 : i1 to i32
    %c0_i32_9 = arith.constant 0 : i32
    %11 = arith.cmpi ne, %10, %c0_i32_9 : i32
    scf.if %11 {
      %c0_10 = arith.constant 0 : index
      %c0_11 = arith.constant 0 : index
      %12 = vector.load %arg3[%c0_10, %c0_11] : memref<8x8xf32, #tpu.memory_space<vmem>>, vector<8x8xf32>
      %cst_12 = arith.constant 4.8828125E-4 : f32
      %13 = vector.broadcast %cst_12 : f32 to vector<8x8xf32>
      %14 = arith.mulf %12, %13 : vector<8x8xf32>
      %c0_13 = arith.constant 0 : index
      %c0_14 = arith.constant 0 : index
      %15 = vector.load %arg2[%c0_13, %c0_14] : memref<8x8xf32, #tpu.memory_space<vmem>>, vector<8x8xf32>
      tpu.vector_store %arg2[%c0_13, %c0_14], %14 {strides = array<i32>} : memref<8x8xf32, #tpu.memory_space<vmem>>, vector<8x8xf32>,
    } else {
    }
    return
  }
  func.func @transform_0(%arg0: i32) -> (i32, i32) {
    %c0_i32 = arith.constant 0 : i32
    %c0_i32_0 = arith.constant 0 : i32
    return %c0_i32, %arg0 : i32, i32
  }
  func.func @transform_1(%arg0: i32) -> (i32, i32) {
    %c0_i32 = arith.constant 0 : i32
    %c0_i32_0 = arith.constant 0 : i32
    %c0_i32_1 = arith.constant 0 : i32
    return %c0_i32, %c0_i32_0 : i32, i32
  }
}

</mosaic_0001>

<bundles_post_ra>
// kernel: tpu_custom_call.1
= control target key start
LH: loop header
LB: loop body
LE: loop exit
PB: predicated region body
PF: predicated region fallthrough
CT: control target
= control target key end

     0   :  { %6 = vsyncpa [#allocation4], 0  ;;  %s215_s0 = inlined_call_operand.hbm [shape: f32[8,256], index: 0, kind: input, shape index: {}]   ;;  %s216_s1 = inlined_call_operand.hbm [shape: f32[8,8], index: 1, kind: output, shape index: {}]  }
   0x1   :  { %7 = vsyncpa [#allocation5], 0  ;;  %s175_s6 = smov [#allocation3]   ;;  %s127_s10 = scalar_lea.hbm %s215_s0, 256 }
   0x2   :  { %s14_s7 = sshll.u32 %s175_s6, 4  ;;  %p128_p0 = scmp.ne.s32.totalorder %s215_s0, %s127_s10  ;;  %s15_s7 = int_to_ptr.vmem [resolvable:$true] %s14_s7 }
   0x3   :  { %p131_p1 = scmp.lt.u32.totalorder %s127_s10, %s215_s0 }
   0x5   :  { %p133_p2 = pnand %p131_p1, %p128_p0 }
   0x7   :  { %136 = shalt.err (!%p133_p2)
}
   0x8   :  { %s137_s15 = scalar_lea.vmem %s15_s7, 256  ;;  %p142_p4 = scmp.lt.s32.totalorder %s15_s7, %s15_s7 }
   0x9   :  { %p138_p3 = scmp.ne.s32.totalorder %s15_s7, %s137_s15  ;;  %p143_p5 = scmp.lt.s32.totalorder %s137_s15, %s137_s15 }
   0xb   :  { %p144_p6 = por %p143_p5, %p142_p4 }
   0xd   :  { %p145_p7 = pnand %p144_p6, %p138_p3 }
   0xf   :  { %148 = shalt.err (!%p145_p7)
}
  0x10   :  { %17 = dma.hbm_to_vmem [thread:$0]  %s215_s0, 256, %s15_s7, [#allocation4]  }
  0x11   :  { %171 = dma.done.wait [#allocation4], 256  }
  0x12   :  { %172 = vsyncadd [#allocation4], 4294967040  ;;  %vm25_vm0 = vcmask 64512   ;;  %v176_v0 = vmov 0.0   ;;  %v29_v1 = vld [vmem:[#allocation3 + $0x8] sm:$0xff]  ;;  %v28_v2 = vld [vmem:[#allocation3] sm:$0xff] }
  0x13   :  { %26 = vst.msk [vmem:[#allocation2] sm:$0xff] %vm25_vm0, %v176_v0  ;;  %30 = vmatprep.subr.mxu0 %v29_v1  ;;  %94 = vmatprep.mubr.f32.mxu0 %v29_v1  ;;  %s177_s18 = smov [#allocation6]  }
  0x14   :  { %31 = vmatpush1.xpose.msra.mxu0 %v28_v2  ;;  %s115_s0 = sshll.u32 %s177_s18, 4  ;;  %s116_s0 = int_to_ptr.vmem [resolvable:$true] %s115_s0 }
  0x15   :  { %s149_s19 = scalar_lea.vmem %s116_s0, 128  ;;  %p154_p9 = scmp.lt.s32.totalorder %s116_s0, %s116_s0 }
  0x16   :  { %p150_p8 = scmp.ne.s32.totalorder %s116_s0, %s149_s19  ;;  %p155_p10 = scmp.lt.s32.totalorder %s149_s19, %s149_s19 }
  0x17   :  { %95 = vmatmul.mubr.f32.vlgmr.msra.gmra.mrb[0].mxu0 %v28_v2 }
  0x18   :  { %p156_p11 = por %p155_p10, %p154_p9 }
  0x1a   :  { %v27_v3 = vld [vmem:[#allocation2] sm:$0xff]  ;;  %p157_p12 = pnand %p156_p11, %p150_p8 }
  0xea   :  { %v96_v4 = vpop.f32.mrb[0].mxu0 }
  0xeb   :  { %v100_v5 = vadd.f32 %v96_v4, %v27_v3  ;;  %v98_v6 = vpop.f32.mrb[1].mxu0 }
  0xed   :  { %102 = vst.msk [vmem:[#allocation2] sm:$0xff] %vm25_vm0, %v100_v5 }
  0xf4   :  { %v106_v7 = vld [vmem:[#allocation2] sm:$0xff] }
  0xf5   :  { %v107_v8 = vmul.f32 0.00048828125, %v106_v7 }
  0xf7   :  { %108 = vst.msk [vmem:[#allocation6] sm:$0xff] %vm25_vm0, %v107_v8 }
  0xf8   :  { %160 = shalt.err (!%p157_p12)
}
  0xf9   :  { %s161_s22 = scalar_lea.hbm %s216_s1, 128 }
  0xfa   :  { %p162_p13 = scmp.ne.s32.totalorder %s216_s1, %s161_s22  ;;  %p165_p0 = scmp.lt.u32.totalorder %s161_s22, %s216_s1 }
  0xfc   :  { %p167_p1 = pnand %p165_p0, %p162_p13 }
  0xfe   :  { %170 = shalt.err (!%p167_p1)
}
  0xff   :  { %118 = dma.vmem_to_hbm [thread:$0]  %s116_s0, 128, %s216_s1, [#allocation5]  }
 0x100   :  { %173 = dma.done.wait [#allocation5], 128  }
 0x101   :  { %174 = vsyncadd [#allocation5], 4294967168 }
 0x102   :  { %122 = vsyncpa [#allocation4], 1 }
 0x103   :  { %123 = vsyncpa [#allocation5], 1 }

</bundles_post_ra>
